<compile_context>
chip_gen: v7x
topology: tpu7x:2x2x1
jax: 0.10.0
libtpu: 0.0.40
codegen_flags: <defaults>
</compile_context>

<pallas_src>
import jax
import jax.numpy as jnp
from jax.experimental import pallas as pl
from jax.experimental.pallas import tpu as pltpu

_MIB = 1024 * 1024


def _normalize_kernel(x_ref, mean_ref, scale_ref, o_ref):
    # x_ref/o_ref: (TR, TW) tiles of the flattened (N*C, H*W) view.
    # mean_ref/scale_ref: (TR, 1) per-row f32 constants, broadcast across lanes.
    x = x_ref[...].astype(jnp.float32)
    o_ref[...] = ((x - mean_ref[...]) * scale_ref[...]).astype(o_ref.dtype)


def _round_up(x: int, m: int) -> int:
    return ((x + m - 1) // m) * m


def _vmem_capacity_bytes() -> int:
    """Physical VMEM per core; conservative 64 MiB fallback if the query fails."""
    try:
        info = pltpu.get_tpu_info()
        cap = int(getattr(info, "vmem_capacity_bytes", 0))
        if cap > 0:
            return cap
    except Exception:
        pass
    return 64 * _MIB  # v7x-sized fallback is safe on every generation


def _choose_tiles(rows: int, hw: int, itemsize: int, row_align: int,
                  tile_cap_bytes: int) -> tuple[int, int]:
    """Fixed aligned tiles; edge blocks are masked by Pallas (pl.cdiv grid)."""
    # Lane-dense spatial tile: multiple of 128, at most 8192 lanes.
    tw = min(_round_up(hw, 128), 8192)
    # Row tile: multiple of the sublane packing, bounded by the per-tile VMEM budget.
    max_rows = max(row_align, (tile_cap_bytes // (tw * itemsize)) // row_align * row_align)
    tr = min(_round_up(rows, row_align), max_rows)

    # Megacore (v7x): make sure there are >=2 parallel blocks to shard whenever the
    # tensor is big enough — prefer splitting the leading row axis.
    if pl.cdiv(rows, tr) == 1 and rows >= 2 * row_align:
        tr = _round_up(pl.cdiv(rows, 2), row_align)
    elif pl.cdiv(rows, tr) == 1 and pl.cdiv(hw, tw) == 1 and hw > 128:
        tw = _round_up(pl.cdiv(hw, 2), 128)
    return tr, tw


def normalize(x: jax.Array, mean: jax.Array, std: jax.Array,
              donate: bool = False) -> jax.Array:
    """(x - mean[None,:,None,None]) / std[None,:,None,None] for NCHW x."""
    N, C, H, W = x.shape
    assert mean.shape == (C,) and std.shape == (C,)

    rows = N * C
    hw = H * W
    itemsize = jnp.dtype(x.dtype).itemsize

    # Per-row (one row == one (n, c) plane) mean and 1/std, kept in f32 so the fold
    # of the divide into a multiply loses no precision for bf16/fp8 inputs.
    mean_rows = jnp.tile(mean.astype(jnp.float32), N).reshape(rows, 1)
    scale_rows = jnp.tile((1.0 / std.astype(jnp.float32)), N).reshape(rows, 1)

    # Free view for contiguous NCHW: (N*C, H*W), lane-dense last dim.
    x2 = x.reshape(rows, hw)

    # Generation-aware tile budget: ~vmem/16 per tile (<= 6 MiB), so the
    # double-buffered in+out footprint (4x tile) stays well under the 32 MiB
    # scoped-VMEM limit we request explicitly below (safe on v5e/v6e/v7x).
    vmem_cap = _vmem_capacity_bytes()
    tile_cap = max(1 * _MIB, min(6 * _MIB, vmem_cap // 16))
    vmem_limit = min(32 * _MIB, vmem_cap // 2)

    # Sublane alignment: 8 rows per vreg for f32, 16 for bf16, 32 for 8-bit dtypes.
    row_align = 8 * max(1, 4 // itemsize)
    tr, tw = _choose_tiles(rows, hw, itemsize, row_align, tile_cap)

    # Row axis outer, spatial axis inner (do not flip): mean/scale blocks are
    # re-DMA'd only once per row-block and output writeback stays contiguous.
    grid = (pl.cdiv(rows, tr), pl.cdiv(hw, tw))

    out2 = pl.pallas_call(
        _normalize_kernel,
        out_shape=jax.ShapeDtypeStruct((rows, hw), x.dtype),
        grid=grid,
        in_specs=[
            pl.BlockSpec((tr, tw), lambda i, j: (i, j)),   # x tile
            pl.BlockSpec((tr, 1), lambda i, j: (i, 0)),    # per-row mean (f32)
            pl.BlockSpec((tr, 1), lambda i, j: (i, 0)),    # per-row 1/std (f32)
        ],
        out_specs=pl.BlockSpec((tr, tw), lambda i, j: (i, j)),
        input_output_aliases=({0: 0} if donate else {}),
        compiler_params=pltpu.CompilerParams(
            dimension_semantics=("parallel", "parallel"),
            vmem_limit_bytes=vmem_limit,
        ),
    )(x2, mean_rows, scale_rows)

    return out2.reshape(N, C, H, W)


if __name__ == "__main__":
    # ImageNet-style per-channel constants, matching the module's 3-channel setup.
    mean = jnp.array([0.485, 0.456, 0.406], dtype=jnp.float32)
    std = jnp.array([0.229, 0.224, 0.225], dtype=jnp.float32)

    key = jax.random.PRNGKey(0)
    x = jax.random.normal(key, (2, 3, 16, 16), dtype=jnp.float32)  # NCHW

    # Reference computed first (kernel may be called with the input donated).
    ref = (x - mean.reshape(1, 3, 1, 1)) / std.reshape(1, 3, 1, 1)

    out = jax.block_until_ready(normalize(x, mean, std, donate=True))

    assert out.shape == x.shape and out.dtype == x.dtype
    assert jnp.allclose(out, ref, atol=1e-5, rtol=1e-5)

    print("KERNEL_OK")
</pallas_src>

<mosaic_0001>
module attributes {stable_mosaic.version = 11 : i64} {
  func.func @_normalize_kernel(%arg0: i32, %arg1: i32, %arg2: memref<8x128xf32, #tpu.memory_space<vmem>>, %arg3: memref<8x1xf32, #tpu.memory_space<vmem>>, %arg4: memref<8x1xf32, #tpu.memory_space<vmem>>, %arg5: memref<8x128xf32, #tpu.memory_space<vmem>>) attributes {dimension_semantics = [#tpu.dimension_semantics<parallel>, #tpu.dimension_semantics<parallel>], iteration_bounds = array<i64: 1, 2>, scalar_prefetch = 0 : i64, scratch_operands = 0 : i64, tpu.core_type = #tpu.core_type<tc>, window_params = [{transform_indices = @transform_0, window_bounds = array<i64: 8, 128>}, {transform_indices = @transform_1, window_bounds = array<i64: 8, 1>}, {transform_indices = @transform_2, window_bounds = array<i64: 8, 1>}, {transform_indices = @transform_3, window_bounds = array<i64: 8, 128>}]} {
    %c0 = arith.constant 0 : index
    %c0_0 = arith.constant 0 : index
    %0 = vector.load %arg2[%c0, %c0_0] : memref<8x128xf32, #tpu.memory_space<vmem>>, vector<8x128xf32>
    %c0_1 = arith.constant 0 : index
    %c0_2 = arith.constant 0 : index
    %1 = vector.load %arg3[%c0_1, %c0_2] : memref<8x1xf32, #tpu.memory_space<vmem>>, vector<8x1xf32>
    %2 = vector.broadcast %1 : vector<8x1xf32> to vector<8x128xf32>
    %3 = arith.subf %0, %2 : vector<8x128xf32>
    %c0_3 = arith.constant 0 : index
    %c0_4 = arith.constant 0 : index
    %4 = vector.load %arg4[%c0_3, %c0_4] : memref<8x1xf32, #tpu.memory_space<vmem>>, vector<8x1xf32>
    %5 = vector.broadcast %4 : vector<8x1xf32> to vector<8x128xf32>
    %6 = arith.mulf %3, %5 : vector<8x128xf32>
    %c0_5 = arith.constant 0 : index
    %c0_6 = arith.constant 0 : index
    %7 = vector.load %arg5[%c0_5, %c0_6] : memref<8x128xf32, #tpu.memory_space<vmem>>, vector<8x128xf32>
    tpu.vector_store %arg5[%c0_5, %c0_6], %6 {strides = array<i32>} : memref<8x128xf32, #tpu.memory_space<vmem>>, vector<8x128xf32>,
    return
  }
  func.func @transform_0(%arg0: i32, %arg1: i32) -> (i32, i32) {
    %c0_i32 = arith.constant 0 : i32
    return %arg0, %arg1 : i32, i32
  }
  func.func @transform_1(%arg0: i32, %arg1: i32) -> (i32, i32) {
    %c0_i32 = arith.constant 0 : i32
    %c0_i32_0 = arith.constant 0 : i32
    return %arg0, %c0_i32 : i32, i32
  }
  func.func @transform_2(%arg0: i32, %arg1: i32) -> (i32, i32) {
    %c0_i32 = arith.constant 0 : i32
    %c0_i32_0 = arith.constant 0 : i32
    return %arg0, %c0_i32 : i32, i32
  }
  func.func @transform_3(%arg0: i32, %arg1: i32) -> (i32, i32) {
    %c0_i32 = arith.constant 0 : i32
    return %arg0, %arg1 : i32, i32
  }
}

</mosaic_0001>

<bundles_post_ra>
// kernel: tpu_custom_call.1
= control target key start
LH: loop header
LB: loop body
LE: loop exit
PB: predicated region body
PF: predicated region fallthrough
CT: control target
= control target key end

     0   :  { %8 = vsyncpa [#allocation3], 0  ;;  %s776_s0 = inlined_call_operand.hbm [shape: f32[6,256], index: 0, kind: input, shape index: {}, may-alias: {0,3}]   ;;  %s777_s1 = inlined_call_operand.vmem [shape: f32[6,1], index: 1, kind: input, shape index: {}]   ;;  %s778_s2 = inlined_call_operand.vmem [shape: f32[6,1], index: 2, kind: input, shape index: {}]   ;;  %s779_s3 = inlined_call_operand.hbm [shape: f32[6,256], index: 3, kind: output, shape index: {}, may-alias: {0,3}]  }
   0x1   :  { %10 = vsyncpa [#allocation3 + $0x1], 0 }
   0x2   :  { %11 = vsyncpa [#allocation4], 0 }
   0x3   :  { %13 = vsyncpa [#allocation4 + $0x1], 0  ;;  %s598_s12 = smov 0   ;;  %s600_s13 = smov 0  }
   0x4   :  { %s602_s14 = smov 0   ;;  %s604_s15 = smov 0  }
   0x5   :  { %s606_s16 = smov 0   ;;  %s608_s17 = smov 0  }
   0x6 LB: > { %s382_s18 = sadd.s32 4294967295, %s573_s17   ;;  %s383_s19 = sadd.s32 4294967294, %s573_s17   ;;  %s573_s17 = sphi %s608_s17, %s19_s17   ;;  %s569_s16 = sphi %s606_s16, %s795_s16   ;;  %s565_s15 = sphi %s604_s15, %s794_s15   ;;  %s561_s14 = sphi %s602_s14, %s793_s14   ;;  %s557_s13 = sphi %s600_s13, %s792_s13   ;;  %s553_s12 = sphi %s598_s12, %s791_s12  }
   0x7   : > { %s28_s20 = sadd.s32 1, %s569_s16  ;;  %s40_s21 = sadd.s32 1, %s561_s14 }
   0x8   : > { %p29_p0 = scmp.ge.s32.totalorder %s28_s20, 2  ;;  %p47_p1 = scmp.ne.s32.totalorder %s561_s14, %s557_s13 }
   0x9   : > { %p48_p2 = scmp.eq.s32.totalorder %s573_s17, 0  ;;  %p53_p3 = scmp.ne.s32.totalorder %s557_s13, %s553_s12 }
   0xa   : > { %s797_s20 = smov (%p29_p0, %s28_s20), 0  ;;  %p54_p5 = scmp.eq.s32.totalorder %s382_s18, 0 }
   0xb   : > { %p639_p4 = por %p48_p2, %p47_p1  ;;  %s36_s23 = ssub.s32 %s569_s16, %s797_s20 }
   0xc   : > { %p131_p6 = scmp.eq.s32.totalorder %s382_s18, 1  ;;  %p38_p7 = scmp.eq.s32.totalorder %s36_s23, 0 }
   0xd   : > { %p645_p8 = por %p54_p5, %p53_p3  ;;  %p137_p10 = scmp.eq.s32.totalorder %s383_s19, 1 }
   0xe   : > { %p649_p9 = por %p131_p6, %p47_p1  ;;  %p409_p13 = scmp.lt.s32.totalorder %s573_s17, 2 }
   0xf   : > { %s654_s26 = scalar_select %p38_p7, %s561_s14, %s40_s21  }
  0x10   : > { %s783_s25 = scalar_select %p649_p9, 1, 0 }
  0x11   : > { %p656_p11 = por %p137_p10, %p53_p3  ;;  %s171_s28 = sand.u32 1, %s561_s14  }
  0x12   : > { %s388_s29 = sshll.u32 %s171_s28, 3  ;;  %s389_s30 = sshll.u32 %s569_s16, 7 }
  0x13   : > { %s784_s27 = scalar_select %p656_p11, 1, 0 }
  0x14   : > { %s667_s6 = scalar_lea.hbm %s776_s0, %s389_s30  ;;  %s175_s7 = scalar_lea.vmem [#allocation2], %s388_s29 }
  0x15   : > { %s184_s8 = sshll.u32 %s175_s7, 4  ;;  %p673_p0 = pnand %p409_p13, %p639_p4  ;;  %s669_s8 = int_to_ptr.vmem [resolvable:$true] %s184_s8 }
  0x16   : > { %s172_s10 = scalar_lea.sflag [#allocation3], %s171_s28  ;;  %s461_s11 = scalar_lea.hbm %s667_s6, 128 }
  0x17   : > { %p462_p3 = scmp.ne.s32.totalorder %s667_s6, %s461_s11  ;;  %p463_p5 = pneg %p673_p0 }
  0x18   : > { %s466_s21 = scalar_lea.hbm %s776_s0, 256  ;;  %p467_p4 = scmp.lt.u32.totalorder %s667_s6, %s776_s0 }
  0x19   : > { %p464_p6 = pnand %p463_p5, %p462_p3  ;;  %p468_p10 = scmp.lt.u32.totalorder %s466_s21, %s461_s11 }
  0x1a   : > { %p470_p12 = scmp.lt.u32.totalorder %s461_s11, %s667_s6 }
  0x1b   : > { %p465_p7 = pneg %p464_p6  ;;  %p469_p13 = por %p468_p10, %p467_p4 }
  0x1d   : > { %p471_p1 = por %p470_p12, %p469_p13 }
  0x1f   : > { %p472_p2 = pnand %p471_p1, %p465_p7 }
  0x21   : > { %475 = shalt.err (!%p472_p2)
}
  0x22   : > { %s476_s28 = scalar_lea.vmem %s669_s8, 128  ;;  %s575_s29 = smov [#allocation2]  }
  0x23   : > { %p477_p3 = scmp.ne.s32.totalorder %s669_s8, %s476_s28  ;;  %s481_s30 = sshll.u32 %s575_s29, 4  ;;  %s482_s30 = int_to_ptr.vmem [resolvable:$false] %s481_s30 }
  0x24   : > { %s483_s4 = scalar_lea.vmem %s482_s30, 256  ;;  %p484_p9 = scmp.lt.s32.totalorder %s669_s8, %s482_s30 }
  0x25   : > { %p479_p6 = pnand %p477_p3, %p463_p5  ;;  %p485_p4 = scmp.lt.s32.totalorder %s483_s4, %s476_s28 }
  0x27   : > { %p480_p11 = pneg %p479_p6  ;;  %p486_p10 = por %p485_p4, %p484_p9 }
  0x29   : > { %p487_p12 = pnand %p486_p10, %p480_p11 }
  0x2b   : > { %490 = shalt.err (!%p487_p12)
}
  0x2c   : > { %404 = dma.hbm_to_vmem [thread:$0]  (!%p673_p0), %s667_s6, 128, %s669_s8, %s172_s10  }
  0x2d   : > { %p786_p1 = scmp.lt.s32.totalorder %s573_s17, 3  ;;  %p787_p2 = scmp.ge.s32.totalorder %s573_s17, 1 }
  0x2f   : > { %p190_p5 = pnand %p787_p2, %p786_p1 }
  0x30   : > { %s709_s5 = sand.u32 (!%p190_p5), 1, %s557_s13  }
  0x31   : > { %193 = sbr.rel (%p190_p5) target bundleno = 207 (0xcf), region = 32  ;;  %s391_s7 = sshll.u32 (!%p190_p5), %s709_s5, 3 }
  0x32   : > { %s196_s11 = scalar_lea.sflag (!%p190_p5), [#allocation3], %s709_s5  ;;  %s199_s18 = scalar_lea.vmem (!%p190_p5), [#allocation2], %s391_s7 }
  0x38   : > { %544 = dma.done.wait (%p645_p8), %s196_s11, 128  }
  0x39   : > { %546 = vsyncadd (%p645_p8), %s196_s11, 4294967168  ;;  %v576_v0 = vmov 0   ;;  %v239_v1 = vld [vmem:[%s777_s1] sm:$0xff]  ;;  %s394_s19 = sshll.u32 %s565_s15, 7  ;;  %s229_s24 = scalar_lea.vmem [#allocation5], %s391_s7 }
  0x3a   : > { %460 = vset.pattern.permute.xlu0 %v576_v0  ;;  %v246_v2 = vld [vmem:[%s778_s2] sm:$0xff]  ;;  %s270_s21 = sshll.u32 %s229_s24, 4  ;;  %s727_s28 = scalar_lea.hbm %s779_s3, %s394_s19  ;;  %s729_s21 = int_to_ptr.vmem [resolvable:$true] %s270_s21 }
  0x3b   : > { %242 = vperm.xlu0 %460, %v239_v1   ;;  %v238_v4 = vld [vmem:[%s199_s18] sm:$0xff]  ;;  %s255_s29 = scalar_lea.sflag [#allocation4], %s709_s5  ;;  %s491_s30 = scalar_lea.vmem %s729_s21, 128 }
  0x3c   : > { %p492_p8 = scmp.ne.s32.totalorder %s729_s21, %s491_s30  ;;  %p788_p9 = scmp.ne.s32.totalorder %s783_s25, 0 }
  0x3d   : > { %s577_s15 = smov [#allocation5]  }
  0x3e   : > { %p493_p11 = pnand %p492_p8, %p788_p9  ;;  %s495_s4 = sshll.u32 %s577_s15, 4  ;;  %s496_s4 = int_to_ptr.vmem [resolvable:$false] %s495_s4 }
  0x3f   : > { %249 = vperm.xlu0 %460, %v246_v2   ;;  %s497_s7 = scalar_lea.vmem %s496_s4, 256  ;;  %p498_p7 = scmp.lt.s32.totalorder %s729_s21, %s496_s4 }
  0x40   : > { %p494_p0 = pneg %p493_p11  ;;  %p499_p13 = scmp.lt.s32.totalorder %s497_s7, %s491_s30 }
  0x42   : > { %p500_p3 = por %p499_p13, %p498_p7 }
  0x44   : > { %p501_p6 = pnand %p500_p3, %p494_p0 }
  0xba   : > { %v243_v3 = vpop.permute.xlu0 %242 }
  0xbb   : > { %v245_v5 = vsub.f32 %v238_v4, %v243_v3 }
  0xbe   : > { %v250_v6 = vpop.permute.xlu0 %249 }
  0xbf   : > { %v252_v7 = vmul.f32 %v250_v6, %v245_v5 }
  0xc1   : > { %253 = vst [vmem:[%s229_s24] sm:$0xff] %v252_v7 }
  0xc2   : > { %504 = shalt.err (!%p501_p6)
}
  0xc3   : > { %s505_s5 = scalar_lea.hbm %s727_s28, 128  ;;  %s509_s6 = scalar_lea.hbm %s779_s3, 256 }
  0xc4   : > { %p506_p4 = scmp.ne.s32.totalorder %s727_s28, %s505_s5  ;;  %p510_p1 = scmp.lt.u32.totalorder %s727_s28, %s779_s3 }
  0xc5   : > { %p511_p2 = scmp.lt.u32.totalorder %s509_s6, %s505_s5  ;;  %p513_p8 = scmp.lt.u32.totalorder %s505_s5, %s727_s28 }
  0xc6   : > { %p507_p10 = pnand %p506_p4, %p788_p9 }
  0xc7   : > { %p512_p5 = por %p511_p2, %p510_p1 }
  0xc8   : > { %p508_p12 = pneg %p507_p10 }
  0xc9   : > { %p514_p11 = por %p513_p8, %p512_p5 }
  0xcb   : > { %p515_p0 = pnand %p514_p11, %p508_p12 }
  0xcd   : > { %518 = shalt.err (!%p515_p0)
}
  0xce   : > { %399 = dma.vmem_to_hbm [thread:$0]  (%p788_p9), %s729_s21, 128, %s727_s28, %s255_s29  }
  0xcf PF: > { %s282_s10 = sand.u32 1, %s553_s12   ;;  %p789_p7 = scmp.ne.s32.totalorder %s784_s27, 0 }
  0xd0   : > { %p790_p13 = scmp.ge.s32.totalorder %s573_s17, 2  ;;  %s283_s19 = scalar_lea.sflag [#allocation4], %s282_s10 }
  0xd2   : > { %p406_p3 = pnand %p790_p13, %p789_p7 }
  0xd4   : > { %548 = dma.done.wait (!%p406_p3), %s283_s19, 128  }
  0xd5   : > { %550 = vsyncadd (!%p406_p3), %s283_s19, 4294967168  ;;  %s19_s17 = sadd.s32 1, %s573_s17   ;;  %s791_s12 = smov %s557_s13 }
  0xd6   : > { %p16_p6 = scmp.ge.s32.totalorder %s19_s17, 4   ;;  %s792_s13 = smov %s561_s14 }
  0xd7   : > { %s793_s14 = smov %s654_s26  ;;  %s794_s15 = smov %s569_s16 }
  0xd8   : > { %s795_s16 = smov %s797_s20  ;;  %18 = sbr.rel (!%p16_p6) target bundleno = 6 (0x6), region = 83 }
  0xdf   :  { %288 = vsyncpa [#allocation3], 1 }
  0xe0   :  { %290 = vsyncpa [#allocation3 + $0x1], 1 }
  0xe1   :  { %291 = vsyncpa [#allocation4], 1 }
  0xe2   :  { %293 = vsyncpa [#allocation4 + $0x1], 1 }

</bundles_post_ra>
